<compile_context>
chip_gen: v6e
topology: v6e:2x2x1
jax: 0.10.0
libtpu: 0.0.40
codegen_flags: <defaults>
</compile_context>

<pallas_src>
import numpy as np
import jax
import jax.numpy as jnp
from jax.experimental import pallas as pl
from jax.experimental.pallas import tpu as pltpu

_LANE = 128
_SUBLANE = 8
# Per buffer-set byte budget for (bu + bi + out) tiles; x2 for double buffering
# => ~12 MiB of VMEM, safe under every generation's scoped-VMEM default.
_VMEM_TILE_BYTES = 6 * 1024 * 1024
_VMEM_LIMIT_BYTES = 32 * 1024 * 1024
# Below this many elements a fused XLA add beats any pallas_call launch.
_SMALL_BATCH_CUTOFF = 1 << 20


def _brentford_kernel(alpha_ref, bu_ref, bi_ref, out_ref):
    # alpha_ref: SMEM (1, 1) scalar; bu_ref / bi_ref / out_ref: VMEM (TR, 128).
    a = alpha_ref[0, 0].astype(jnp.float32)
    out_ref[...] = (
        a + bu_ref[...].astype(jnp.float32) + bi_ref[...].astype(jnp.float32)
    ).astype(out_ref.dtype)


def _tile_rows(rows, bu_dtype, bi_dtype, out_dtype):
    """Pick a row-tile: big (bandwidth), multiple of 8, and >= 2 grid steps."""
    bytes_per_row = _LANE * (
        jnp.dtype(bu_dtype).itemsize
        + jnp.dtype(bi_dtype).itemsize
        + jnp.dtype(out_dtype).itemsize
    )
    max_rows = max(_SUBLANE, (_VMEM_TILE_BYTES // bytes_per_row) // _SUBLANE * _SUBLANE)
    if rows <= _SUBLANE:
        return rows  # single tiny block; block shape == full array dim is legal
    # Cap at half the rows so the grid has >= 2 steps and v7x's second
    # TensorCore gets work (free on single-TC v5e/v6e). Round up to a sublane
    # multiple; Pallas masks the ragged last block.
    tr = min(max_rows, -(-rows // 2))
    return -(-tr // _SUBLANE) * _SUBLANE


def brentford_forward(alpha, bu, bi, *, min_pallas_elems=_SMALL_BATCH_CUTOFF):
    """alpha: shape-(1,) f32; bu, bi: identical-shape bias arrays. Returns alpha+bu+bi."""
    assert bu.shape == bi.shape, "bu and bi must have identical shapes"
    orig_shape = bu.shape
    n = int(np.prod(orig_shape)) if len(orig_shape) else 1
    out_dtype = jnp.result_type(bu.dtype, bi.dtype, jnp.float32)

    n_main = (n // _LANE) * _LANE
    if n < min_pallas_elems or n_main == 0:
        # Launch + pipeline-prologue overhead dominates at this size; let XLA
        # fuse the add (and the upstream gathers) instead.
        return jnp.reshape(alpha, (1,)).astype(jnp.float32) + bu + bi

    bu_flat = jnp.ravel(bu)
    bi_flat = jnp.ravel(bi)
    tail = n - n_main
    rows = n_main // _LANE

    # 128-aligned prefix as a (rows, 128) view — a free reshape, no padding.
    bu_main = (bu_flat[:n_main] if tail else bu_flat).reshape(rows, _LANE)
    bi_main = (bi_flat[:n_main] if tail else bi_flat).reshape(rows, _LANE)
    alpha2 = jnp.reshape(alpha, (1, 1)).astype(jnp.float32)

    tr = _tile_rows(rows, bu.dtype, bi.dtype, out_dtype)
    grid = (pl.cdiv(rows, tr),)

    out2 = pl.pallas_call(
        _brentford_kernel,
        out_shape=jax.ShapeDtypeStruct((rows, _LANE), out_dtype),
        grid=grid,
        in_specs=[
            # Whole (1,1) alpha lives untiled in SMEM.
            pl.BlockSpec(memory_space=pltpu.MemorySpace.SMEM),
            pl.BlockSpec((tr, _LANE), lambda i: (i, 0)),
            pl.BlockSpec((tr, _LANE), lambda i: (i, 0)),
        ],
        out_specs=pl.BlockSpec((tr, _LANE), lambda i: (i, 0)),
        compiler_params=pltpu.CompilerParams(
            dimension_semantics=("parallel",),  # split rows across TCs on v7x
            vmem_limit_bytes=_VMEM_LIMIT_BYTES,
        ),
    )(alpha2, bu_main, bi_main)

    result = out2.reshape(-1)
    if tail:
        # <128-element ragged tail via plain XLA; one small concat instead of
        # the previous pad + final-slice (3 full extra HBM passes -> 1).
        tail_out = (
            alpha2[0, 0]
            + bu_flat[n_main:].astype(jnp.float32)
            + bi_flat[n_main:].astype(jnp.float32)
        ).astype(out_dtype)
        result = jnp.concatenate([result, tail_out])
    return result.reshape(orig_shape)


if __name__ == "__main__":
    key = jax.random.PRNGKey(0)
    k1, k2, k3, k4, k5, k6, k7 = jax.random.split(key, 7)

    # Deterministic "parameters" matching Brentford.__init__ shapes.
    K = 4                 # latent dim placeholder; unused by forward
    user_size = 32
    item_size = 48
    beta_user = jax.random.normal(k1, (user_size,), dtype=jnp.float32)
    beta_item = jax.random.normal(k2, (item_size,), dtype=jnp.float32)
    alpha = jax.random.normal(k3, (1,), dtype=jnp.float32)

    # 1) Small aligned batch, forced through the Pallas kernel.
    batch = 1024
    user_idx = jax.random.randint(k4, (batch,), 0, user_size)
    item_idx = jax.random.randint(k5, (batch,), 0, item_size)
    bu = beta_user[user_idx]
    bi = beta_item[item_idx]
    out = jax.block_until_ready(brentford_forward(alpha, bu, bi, min_pallas_elems=0))
    ref = alpha[0] + bu + bi
    np.testing.assert_allclose(np.asarray(out), np.asarray(ref), rtol=1e-6, atol=1e-6)

    # 2) Same batch through the default small-batch XLA dispatch path.
    out_small = jax.block_until_ready(brentford_forward(alpha, bu, bi))
    np.testing.assert_allclose(np.asarray(out_small), np.asarray(ref), rtol=1e-6, atol=1e-6)

    # 3) Ragged size: multi-tile grid (>=2 steps), masked edge block, XLA tail.
    batch2 = 200_003
    user_idx2 = jax.random.randint(k6, (batch2,), 0, user_size)
    item_idx2 = jax.random.randint(k7, (batch2,), 0, item_size)
    bu2 = beta_user[user_idx2]
    bi2 = beta_item[item_idx2]
    out2 = jax.block_until_ready(brentford_forward(alpha, bu2, bi2, min_pallas_elems=0))
    ref2 = alpha[0] + bu2 + bi2
    np.testing.assert_allclose(np.asarray(out2), np.asarray(ref2), rtol=1e-6, atol=1e-6)

    print("KERNEL_OK")
</pallas_src>

<mosaic_0001>
module attributes {stable_mosaic.version = 11 : i64} {
  func.func @_brentford_kernel(%arg0: i32, %arg1: memref<1x1xf32, #tpu.memory_space<smem>>, %arg2: memref<8x128xf32, #tpu.memory_space<vmem>>, %arg3: memref<8x128xf32, #tpu.memory_space<vmem>>, %arg4: memref<8x128xf32, #tpu.memory_space<vmem>>) attributes {dimension_semantics = [#tpu.dimension_semantics<parallel>], iteration_bounds = array<i64: 1>, scalar_prefetch = 0 : i64, scratch_operands = 0 : i64, tpu.core_type = #tpu.core_type<tc>, window_params = [{transform_indices = @transform_0, window_bounds = array<i64: 1, 1>}, {transform_indices = @transform_1, window_bounds = array<i64: 8, 128>}, {transform_indices = @transform_2, window_bounds = array<i64: 8, 128>}, {transform_indices = @transform_3, window_bounds = array<i64: 8, 128>}]} {
    %c0 = arith.constant 0 : index
    %c0_0 = arith.constant 0 : index
    %0 = memref.load %arg1[%c0, %c0_0] : memref<1x1xf32, #tpu.memory_space<smem>>
    %c0_1 = arith.constant 0 : index
    %c0_2 = arith.constant 0 : index
    %1 = vector.load %arg2[%c0_1, %c0_2] : memref<8x128xf32, #tpu.memory_space<vmem>>, vector<8x128xf32>
    %2 = vector.broadcast %0 : f32 to vector<8x128xf32>
    %3 = arith.addf %2, %1 : vector<8x128xf32>
    %c0_3 = arith.constant 0 : index
    %c0_4 = arith.constant 0 : index
    %4 = vector.load %arg3[%c0_3, %c0_4] : memref<8x128xf32, #tpu.memory_space<vmem>>, vector<8x128xf32>
    %5 = arith.addf %3, %4 : vector<8x128xf32>
    %c0_5 = arith.constant 0 : index
    %c0_6 = arith.constant 0 : index
    %6 = vector.load %arg4[%c0_5, %c0_6] : memref<8x128xf32, #tpu.memory_space<vmem>>, vector<8x128xf32>
    tpu.vector_store %arg4[%c0_5, %c0_6], %5 {strides = array<i32>} : memref<8x128xf32, #tpu.memory_space<vmem>>, vector<8x128xf32>,
    return
  }
  func.func @transform_0(%arg0: i32) -> (i32, i32) {
    %c0_i32 = arith.constant 0 : i32
    %c0_i32_0 = arith.constant 0 : i32
    %c0_i32_1 = arith.constant 0 : i32
    return %c0_i32, %c0_i32_0 : i32, i32
  }
  func.func @transform_1(%arg0: i32) -> (i32, i32) {
    %c0_i32 = arith.constant 0 : i32
    %c0_i32_0 = arith.constant 0 : i32
    return %arg0, %c0_i32 : i32, i32
  }
  func.func @transform_2(%arg0: i32) -> (i32, i32) {
    %c0_i32 = arith.constant 0 : i32
    %c0_i32_0 = arith.constant 0 : i32
    return %arg0, %c0_i32 : i32, i32
  }
  func.func @transform_3(%arg0: i32) -> (i32, i32) {
    %c0_i32 = arith.constant 0 : i32
    %c0_i32_0 = arith.constant 0 : i32
    return %arg0, %c0_i32 : i32, i32
  }
}

</mosaic_0001>

<bundles_post_ra>
// kernel: tpu_custom_call.1
= control target key start
LH: loop header
LB: loop body
LE: loop exit
PB: predicated region body
PF: predicated region fallthrough
CT: control target
= control target key end

     0   :  { %9 = vsyncpa [#allocation4], 0  ;;  %s167_s0 = inlined_call_operand.<no memory space> [shape: f32[1,1], index: 0, kind: input, shape index: {}]   ;;  %s168_s1 = inlined_call_operand.hbm [shape: f32[8,128], index: 1, kind: input, shape index: {}]   ;;  %s169_s2 = inlined_call_operand.hbm [shape: f32[8,128], index: 2, kind: input, shape index: {}]   ;;  %s170_s3 = inlined_call_operand.hbm [shape: f32[8,128], index: 3, kind: output, shape index: {}]  }
   0x1   :  { %10 = vsyncpa [#allocation7], 0 }
   0x2   :  { %11 = vsyncpa [#allocation5], 0  ;;  %s132_s12 = smov [#allocation3]   ;;  %s133_s14 = smov [#allocation6]  }
   0x3   :  { %s20_s13 = sshll.u32 %s132_s12, 4  ;;  %s30_s15 = sshll.u32 %s133_s14, 4  ;;  %s21_s13 = int_to_ptr.vmem [resolvable:$true] %s20_s13  ;;  %s31_s15 = int_to_ptr.vmem [resolvable:$true] %s30_s15 }
   0x4   :  { %s74_s16 = scalar_lea.vmem %s21_s13, 128  ;;  %p79_p1 = scmp.lt.s32.totalorder %s21_s13, %s21_s13 }
   0x5   :  { %p75_p0 = scmp.ne.s32.totalorder %s21_s13, %s74_s16  ;;  %p80_p2 = scmp.lt.s32.totalorder %s74_s16, %s74_s16 }
   0x7   :  { %p81_p3 = por %p80_p2, %p79_p1 }
   0x9   :  { %p82_p4 = pnand %p81_p3, %p75_p0 }
   0xb   :  { %85 = shalt.err (!%p82_p4)
}
   0xc   :  { %23 = dma.hbm_to_vmem [thread:$0]  %s168_s1, 128, %s21_s13, [#allocation4]  }
   0xd   :  { %s94_s19 = scalar_lea.vmem %s31_s15, 128  ;;  %p99_p6 = scmp.lt.s32.totalorder %s31_s15, %s31_s15 }
   0xe   :  { %p95_p5 = scmp.ne.s32.totalorder %s31_s15, %s94_s19  ;;  %p100_p7 = scmp.lt.s32.totalorder %s94_s19, %s94_s19 }
  0x10   :  { %p101_p8 = por %p100_p7, %p99_p6 }
  0x12   :  { %p102_p9 = pnand %p101_p8, %p95_p5 }
  0x14   :  { %105 = shalt.err (!%p102_p9)
}
  0x15   :  { %33 = dma.hbm_to_vmem [thread:$0]  %s169_s2, 128, %s31_s15, [#allocation7]  }
  0x16   :  { %126 = dma.done.wait [#allocation4], 128  }
  0x17   :  { %127 = vsyncadd [#allocation4], 4294967168 }
  0x18   :  { %128 = dma.done.wait [#allocation7], 128  }
  0x19   :  { %129 = vsyncadd [#allocation7], 4294967168  ;;  %v42_v0 = vstv %s167_s0  ;;  %v41_v1 = vld [vmem:[#allocation3] sm:$0xff]  ;;  %v44_v2 = vld [vmem:[#allocation6] sm:$0xff]  ;;  %s134_s1 = smov [#allocation8]  }
  0x1a   :  { %s53_s24 = sshll.u32 %s134_s1, 4  ;;  %v43_v3 = vadd.f32 %v42_v0, %v41_v1  ;;  %s54_s24 = int_to_ptr.vmem [resolvable:$true] %s53_s24 }
  0x1b   :  { %s106_s25 = scalar_lea.vmem %s54_s24, 128  ;;  %p111_p11 = scmp.lt.s32.totalorder %s54_s24, %s54_s24 }
  0x1c   :  { %v45_v4 = vadd.f32 %v44_v2, %v43_v3  ;;  %p107_p10 = scmp.ne.s32.totalorder %s54_s24, %s106_s25  ;;  %p112_p12 = scmp.lt.s32.totalorder %s106_s25, %s106_s25 }
  0x1e   :  { %46 = vst [vmem:[#allocation8] sm:$0xff] %v45_v4  ;;  %p113_p13 = por %p112_p12, %p111_p11 }
  0x20   :  { %p114_p0 = pnand %p113_p13, %p107_p10 }
  0x22   :  { %117 = shalt.err (!%p114_p0)
}
  0x23   :  { %56 = dma.vmem_to_hbm [thread:$0]  %s54_s24, 128, %s170_s3, [#allocation5]  }
  0x24   :  { %130 = dma.done.wait [#allocation5], 128  }
  0x25   :  { %131 = vsyncadd [#allocation5], 4294967168 }
  0x26   :  { %60 = vsyncpa [#allocation4], 1 }
  0x27   :  { %61 = vsyncpa [#allocation7], 1 }
  0x28   :  { %62 = vsyncpa [#allocation5], 1 }

</bundles_post_ra>
